<compile_context>
chip_gen: v5e
topology: v5e:2x2
jax: 0.10.0
libtpu: 0.0.40
codegen_flags: <defaults>
</compile_context>

<pallas_src>
import functools

import jax
import jax.numpy as jnp
import numpy as np
from jax.experimental import pallas as pl
from jax.experimental.pallas import tpu as pltpu

_LANE = 128


def _cdiv(a: int, b: int) -> int:
    return -(-a // b)


def _round_up(x: int, m: int) -> int:
    return _cdiv(x, m) * m


def _pool_matrix(in_size: int, out_size: int) -> np.ndarray:
    """Averaging matrix M (out_size, in_size) with PyTorch's adaptive rule."""
    m = np.zeros((out_size, in_size), dtype=np.float32)
    for i in range(out_size):
        start = (i * in_size) // out_size
        end = _cdiv((i + 1) * in_size, out_size)
        m[i, start:end] = 1.0 / (end - start)
    return m


def _block_diag(mat: np.ndarray, g: int) -> np.ndarray:
    r, c = mat.shape
    out = np.zeros((g * r, g * c), dtype=mat.dtype)
    for k in range(g):
        out[k * r:(k + 1) * r, k * c:(k + 1) * c] = mat
    return out


def _vmem_plan():
    """(block_budget_bytes, vmem_limit_bytes), chosen per TPU generation."""
    cap = None
    try:
        cap = getattr(pltpu.get_tpu_info(), "vmem_capacity_bytes", None)
    except Exception:
        cap = None
    if cap is None:
        cap = 64 << 20                      # conservative fallback (v7x size)
    if cap >= (128 << 20):                  # v5e / v6e: 128 MiB physical VMEM
        return 72 << 20, 100 << 20
    # v7x: 64 MiB physical VMEM; leave headroom for compiler scratch.
    return 28 << 20, 46 << 20


def _pick_group(nc: int, hw: int, ohow: int, itemsize: int,
                max_pt_bytes: int = 2 << 20, max_g: int = 256) -> int:
    """Channels packed per block row (lane-dense packing for small H*W)."""
    if hw >= _LANE:
        return 1
    best_g = 1
    best_score = float(_round_up(hw, _LANE) + _round_up(ohow, _LANE))
    g_cap = max(1, min(max_g, nc))
    for g in range(2, g_cap + 1):
        pt_bytes = _round_up(g * hw, 8) * _round_up(g * ohow, _LANE) * itemsize
        if pt_bytes > max_pt_bytes:
            break
        score = (_round_up(g * hw, _LANE) + _round_up(g * ohow, _LANE)) / g
        if score < best_score * 0.98:       # require a real win; prefer small G
            best_g, best_score = g, score
    return best_g


def _pick_rows_per_block(n_rows: int, in_elems: int, out_elems: int,
                         itemsize: int, block_budget: int, sub: int) -> int:
    """Rows (of G packed channels) per grid step."""
    in_b = _round_up(in_elems, _LANE) * itemsize
    out_b = _round_up(out_elems, _LANE) * itemsize
    per_row = 2 * (in_b + out_b)            # double-buffered input + output row
    tb = max(sub, (max(block_budget, per_row * sub) // per_row // sub) * sub)
    tb = min(tb, 4096)
    rows_s = _round_up(max(n_rows, 1), sub)
    if tb >= rows_s:
        # Whole problem fits in one step: split into two even steps (when the
        # row count allows) so the "parallel" grid axis can be sharded across
        # v7x's two TensorCores.  No effect on v5e/v6e (single TC).
        tb = _round_up(_cdiv(rows_s, 2), sub) if rows_s >= 2 * sub else rows_s
    else:
        steps = _cdiv(rows_s, tb)
        if steps % 2 == 1 and steps <= 9 and tb > sub:
            # Shrink tb a notch or two to make the (small) step count even.
            for t in range(tb - sub, max(sub, tb - 4 * sub) - 1, -sub):
                if _cdiv(rows_s, t) % 2 == 0:
                    tb = t
                    break
    return tb


def _adaptive_avg_pool_kernel(pt_ref, x_ref, o_ref):
    # pt_ref: (G*H*W, G*OH*OW) block-diagonal pooling matrix P.T.  Its block
    #         index is constant, so the pipeline fetches it once and it stays
    #         resident in VMEM across grid steps.
    # x_ref:  (TB, G*H*W)   TB rows of G packed channels (spatial on lanes).
    # o_ref:  (TB, G*OH*OW) lane-dense output slab.
    # MXU matmul with f32 accumulation.  On v7x, if a larger-HW variant ever
    # flips this from DMA-bound to MXU-bound, cast x/P.T to bf16 here.
    o_ref[...] = jnp.dot(
        x_ref[...], pt_ref[...], preferred_element_type=jnp.float32
    ).astype(o_ref.dtype)


@functools.partial(jax.jit, static_argnames=("output_size",))
def adaptive_avg_pool2d(x, output_size):
    """x: (N, C, H, W) float array. output_size: int or (OH, OW)."""
    if isinstance(output_size, int):
        oh, ow = output_size, output_size
    else:
        oh, ow = output_size
    n, c, h, w = x.shape
    if oh is None:
        oh = h
    if ow is None:
        ow = w

    nc, hw, ohow = n * c, h * w, oh * ow
    itemsize = jnp.dtype(x.dtype).itemsize
    sub = 8 * max(1, 4 // itemsize)          # dtype-aware sublane packing

    # Lane-dense packing factor: G channels per block row.
    g = _pick_group(nc, hw, ohow, itemsize)
    row_in, row_out = g * hw, g * ohow
    rows = _cdiv(nc, g)

    # Host-built, pre-transposed (block-diagonal) pooling matrix.  Cast to
    # x.dtype: for bf16 inputs the 1/3, 1/7, ... weights round to bf16 but the
    # accumulation stays f32 (within bf16 tolerance of an f32 reference).
    pt_single = np.kron(_pool_matrix(h, oh), _pool_matrix(w, ow)).T  # (hw, ohow)
    pt = jnp.asarray(_block_diag(pt_single, g), dtype=x.dtype)

    # Per-generation VMEM budgeting; charge the double-buffered P.T block.
    block_budget, vmem_limit = _vmem_plan()
    pt_vmem = _round_up(row_in, sub) * _round_up(row_out, _LANE) * itemsize
    tb = _pick_rows_per_block(rows, row_in, row_out, itemsize,
                              block_budget - 2 * pt_vmem, sub)
    rows_pad = _round_up(rows, tb)

    # Flatten / zero-pad / pack channels: (N*C, H*W) -> (rows_pad, G*H*W).
    x_flat = x.reshape(nc, hw)
    pad = rows_pad * g - nc
    if pad:
        x_flat = jnp.pad(x_flat, ((0, pad), (0, 0)))
    x_flat = x_flat.reshape(rows_pad, row_in)

    # Advisory cost: padded rows, lane-padded row widths, plus the P.T block.
    cost = pl.CostEstimate(
        flops=2 * rows_pad * row_in * row_out,
        transcendentals=0,
        bytes_accessed=(rows_pad * (_round_up(row_in, _LANE)
                                    + _round_up(row_out, _LANE))
                        + _round_up(row_in, 8) * _round_up(row_out, _LANE))
                       * itemsize,
    )

    out_flat = pl.pallas_call(
        _adaptive_avg_pool_kernel,
        out_shape=jax.ShapeDtypeStruct((rows_pad, row_out), x.dtype),
        grid_spec=pltpu.PrefetchScalarGridSpec(
            num_scalar_prefetch=0,
            grid=(rows_pad // tb,),
            in_specs=[
                pl.BlockSpec((row_in, row_out), lambda i: (0, 0)),  # P.T (const)
                pl.BlockSpec((tb, row_in), lambda i: (i, 0)),       # x rows
            ],
            out_specs=pl.BlockSpec((tb, row_out), lambda i: (i, 0)),
        ),
        compiler_params=pltpu.CompilerParams(
            dimension_semantics=("parallel",),
            vmem_limit_bytes=vmem_limit,
        ),
        cost_estimate=cost,
    )(pt, x_flat)

    # Unpack groups, drop padded channels (never read beyond nc).
    out = out_flat.reshape(rows_pad * g, ohow)[:nc]
    return out.reshape(n, c, oh, ow)


def _reference(x, oh, ow):
    a = jnp.asarray(_pool_matrix(x.shape[2], oh))
    b = jnp.asarray(_pool_matrix(x.shape[3], ow))
    return jnp.einsum("oh,nchw,pw->ncop", a, x, b)


if __name__ == "__main__":
    key = jax.random.PRNGKey(0)

    # Case 1: NCHW input, non-divisible output windows (H*W >= 128 path, G=1).
    x = jax.random.normal(key, (2, 4, 16, 16), dtype=jnp.float32)
    out = jax.block_until_ready(adaptive_avg_pool2d(x, (5, 3)))
    ref = _reference(x, 5, 3)
    assert out.shape == (2, 4, 5, 3), out.shape
    np.testing.assert_allclose(np.asarray(out), np.asarray(ref),
                               rtol=1e-5, atol=1e-5)

    # Case 2: odd shapes + int output_size (H*W < 128 -> lane-dense packing).
    x2 = jax.random.normal(jax.random.PRNGKey(1), (1, 3, 13, 9),
                           dtype=jnp.float32)
    out2 = jax.block_until_ready(adaptive_avg_pool2d(x2, 4))
    ref2 = _reference(x2, 4, 4)
    assert out2.shape == (1, 3, 4, 4), out2.shape
    np.testing.assert_allclose(np.asarray(out2), np.asarray(ref2),
                               rtol=1e-5, atol=1e-5)

    # Case 3: global pooling (output_size=1, tiny OH*OW -> heavy packing path).
    x3 = jax.random.normal(jax.random.PRNGKey(2), (2, 8, 7, 7),
                           dtype=jnp.float32)
    out3 = jax.block_until_ready(adaptive_avg_pool2d(x3, 1))
    ref3 = _reference(x3, 1, 1)
    assert out3.shape == (2, 8, 1, 1), out3.shape
    np.testing.assert_allclose(np.asarray(out3), np.asarray(ref3),
                               rtol=1e-5, atol=1e-5)

    print("KERNEL_OK")
</pallas_src>

<mosaic_0001>
module attributes {stable_mosaic.version = 11 : i64} {
  func.func @_adaptive_avg_pool_kernel(%arg0: i32, %arg1: memref<256x15xf32, #tpu.memory_space<vmem>>, %arg2: memref<8x256xf32, #tpu.memory_space<vmem>>, %arg3: memref<8x15xf32, #tpu.memory_space<vmem>>) attributes {dimension_semantics = [#tpu.dimension_semantics<parallel>], iteration_bounds = array<i64: 1>, scalar_prefetch = 0 : i64, scratch_operands = 0 : i64, tpu.core_type = #tpu.core_type<tc>, window_params = [{pipeline_mode = #tpu.pipeline_mode<synchronous>, transform_indices = @transform_0, window_bounds = array<i64: 256, 15>}, {transform_indices = @transform_1, window_bounds = array<i64: 8, 256>}, {transform_indices = @transform_2, window_bounds = array<i64: 8, 15>}]} {
    %c0 = arith.constant 0 : index
    %c0_0 = arith.constant 0 : index
    %0 = vector.load %arg2[%c0, %c0_0] : memref<8x256xf32, #tpu.memory_space<vmem>>, vector<8x256xf32>
    %c0_1 = arith.constant 0 : index
    %c0_2 = arith.constant 0 : index
    %1 = vector.load %arg1[%c0_1, %c0_2] : memref<256x15xf32, #tpu.memory_space<vmem>>, vector<256x15xf32>
    %cst = arith.constant dense<0.000000e+00> : vector<8x15xf32>
    %2 = tpu.matmul %0, %1, %cst {dimension_numbers = #tpu.dot_dimension_numbers<[1], [0], [0], [1], [0, 0, 1, 1], [], []>} : vector<8x256xf32>, vector<256x15xf32>, vector<8x15xf32> -> vector<8x15xf32>
    %c0_3 = arith.constant 0 : index
    %c0_4 = arith.constant 0 : index
    %3 = vector.load %arg3[%c0_3, %c0_4] : memref<8x15xf32, #tpu.memory_space<vmem>>, vector<8x15xf32>
    tpu.vector_store %arg3[%c0_3, %c0_4], %2 {strides = array<i32>} : memref<8x15xf32, #tpu.memory_space<vmem>>, vector<8x15xf32>,
    return
  }
  func.func @transform_0(%arg0: i32) -> (i32, i32) {
    %c0_i32 = arith.constant 0 : i32
    %c0_i32_0 = arith.constant 0 : i32
    %c0_i32_1 = arith.constant 0 : i32
    return %c0_i32, %c0_i32_0 : i32, i32
  }
  func.func @transform_1(%arg0: i32) -> (i32, i32) {
    %c0_i32 = arith.constant 0 : i32
    %c0_i32_0 = arith.constant 0 : i32
    return %arg0, %c0_i32 : i32, i32
  }
  func.func @transform_2(%arg0: i32) -> (i32, i32) {
    %c0_i32 = arith.constant 0 : i32
    %c0_i32_0 = arith.constant 0 : i32
    return %arg0, %c0_i32 : i32, i32
  }
}

</mosaic_0001>

<bundles_post_ra>
// kernel: adaptive_avg_pool2d.1
= control target key start
LH: loop header
LB: loop body
LE: loop exit
PB: predicated region body
PF: predicated region fallthrough
CT: control target
= control target key end

     0   :  { %7 = vsyncpa [#allocation3], 0  ;;  %s137_s12 = smov [#allocation2]   ;;  %s138_s14 = smov 128   ;;  %s167_s0 = inlined_call_operand.hbm [shape: f32[256,15], index: 0, kind: input, shape index: {}]   ;;  %s168_s1 = inlined_call_operand.vmem [shape: f32[8,256], index: 1, kind: input, shape index: {}]   ;;  %s169_s2 = inlined_call_operand.vmem [shape: f32[8,15], index: 2, kind: output, shape index: {}]  }
   0x1   :  { %s12_s11 = sshll.u32 %s167_s0, 4  ;;  %s14_s13 = sshll.u32 %s137_s12, 4  ;;  %s13_s11 = int_to_ptr.hbm [resolvable:$true] %s12_s11  ;;  %s15_s13 = int_to_ptr.vmem [resolvable:$true] %s14_s13 }
   0x2   :  { %s139_s15 = smov 8  }
   0x3   :  { %20 = dma.hbm_to_vmem [thread:$0]  %s13_s11, 4096, %s15_s13, [#allocation3], %s138_s14, %s138_s14, %s139_s15  }
   0x4   :  { %135 = dma.done.wait [#allocation3], 4096  }
   0x5   :  { %136 = vsyncadd [#allocation3], 4294963200  ;;  %v44_v0 = vld [vmem:[#allocation2 + $0x78] sm:$0xff]  ;;  %v43_v2 = vld [vmem:[#allocation2 + $0x70] sm:$0xff]  ;;  %vm101_vm0 = vcmask 121856  }
   0x6   :  { %v60_v1 = vld [vmem:[#allocation2 + $0xf8] sm:$0xff]  ;;  %61 = vmatpush.msra.mxu0 %v44_v0  ;;  %v59_v3 = vld [vmem:[#allocation2 + $0xf0] sm:$0xff]  ;;  %v42_v4 = vld [vmem:[#allocation2 + $0x68] sm:$0xff] }
   0x7   :  { %81 = vmatpush.msra.mxu1 %v60_v1  ;;  %v58_v5 = vld [vmem:[#allocation2 + $0xe8] sm:$0xff]  ;;  %v41_v6 = vld [vmem:[#allocation2 + $0x60] sm:$0xff]  ;;  %v40_v8 = vld [vmem:[#allocation2 + $0x58] sm:$0xff] }
   0x8   :  { %62 = vmatpush.msra.mxu0 %v43_v2  ;;  %v57_v7 = vld [vmem:[#allocation2 + $0xe0] sm:$0xff]  ;;  %v56_v9 = vld [vmem:[#allocation2 + $0xd8] sm:$0xff]  ;;  %v39_v10 = vld [vmem:[#allocation2 + $0x50] sm:$0xff] }
   0x9   :  { %82 = vmatpush.msra.mxu1 %v59_v3  ;;  %v55_v11 = vld [vmem:[#allocation2 + $0xd0] sm:$0xff]  ;;  %v38_v12 = vld [vmem:[#allocation2 + $0x48] sm:$0xff]  ;;  %v37_v14 = vld [vmem:[#allocation2 + $0x40] sm:$0xff] }
   0xa   :  { %63 = vmatpush.msra.mxu0 %v42_v4  ;;  %v54_v13 = vld [vmem:[#allocation2 + $0xc8] sm:$0xff]  ;;  %v53_v15 = vld [vmem:[#allocation2 + $0xc0] sm:$0xff]  ;;  %v36_v16 = vld [vmem:[#allocation2 + $0x38] sm:$0xff] }
   0xb   :  { %83 = vmatpush.msra.mxu1 %v58_v5  ;;  %v52_v17 = vld [vmem:[#allocation2 + $0xb8] sm:$0xff]  ;;  %v35_v18 = vld [vmem:[#allocation2 + $0x30] sm:$0xff]  ;;  %v34_v20 = vld [vmem:[#allocation2 + $0x28] sm:$0xff] }
   0xc   :  { %64 = vmatpush.msra.mxu0 %v41_v6  ;;  %v51_v19 = vld [vmem:[#allocation2 + $0xb0] sm:$0xff]  ;;  %v50_v21 = vld [vmem:[#allocation2 + $0xa8] sm:$0xff]  ;;  %v33_v22 = vld [vmem:[#allocation2 + $0x20] sm:$0xff] }
   0xd   :  { %84 = vmatpush.msra.mxu1 %v57_v7  ;;  %v49_v23 = vld [vmem:[#allocation2 + $0xa0] sm:$0xff]  ;;  %v32_v24 = vld [vmem:[#allocation2 + $0x18] sm:$0xff]  ;;  %v31_v26 = vld [vmem:[#allocation2 + $0x10] sm:$0xff] }
   0xe   :  { %65 = vmatpush.msra.mxu0 %v40_v8  ;;  %v48_v25 = vld [vmem:[#allocation2 + $0x98] sm:$0xff]  ;;  %v47_v27 = vld [vmem:[#allocation2 + $0x90] sm:$0xff]  ;;  %v30_v28 = vld [vmem:[#allocation2 + $0x8] sm:$0xff] }
   0xf   :  { %85 = vmatpush.msra.mxu1 %v56_v9  ;;  %v46_v29 = vld [vmem:[#allocation2 + $0x88] sm:$0xff]  ;;  %v29_v30 = vld [vmem:[#allocation2] sm:$0xff] }
  0x10   :  { %66 = vmatpush.msra.mxu0 %v39_v10  ;;  %v45_v31 = vld [vmem:[#allocation2 + $0x80] sm:$0xff]  ;;  %v28_v33 = vld [vmem:[%s168_s1 + $0x8] sm:$0xff] }
  0x11   :  { %86 = vmatpush.msra.mxu1 %v55_v11  ;;  %v27_v32 = vld [vmem:[%s168_s1] sm:$0xff] }
  0x12   :  { %67 = vmatpush.msra.mxu0 %v38_v12 }
  0x13   :  { %87 = vmatpush.msra.mxu1 %v54_v13 }
  0x14   :  { %68 = vmatpush.msra.mxu0 %v37_v14 }
  0x15   :  { %88 = vmatpush.msra.mxu1 %v53_v15 }
  0x16   :  { %69 = vmatpush.msra.mxu0 %v36_v16 }
  0x17   :  { %89 = vmatpush.msra.mxu1 %v52_v17 }
  0x18   :  { %70 = vmatpush.msra.mxu0 %v35_v18 }
  0x19   :  { %90 = vmatpush.msra.mxu1 %v51_v19 }
  0x1a   :  { %71 = vmatpush.msra.mxu0 %v34_v20 }
  0x1b   :  { %91 = vmatpush.msra.mxu1 %v50_v21 }
  0x1c   :  { %72 = vmatpush.msra.mxu0 %v33_v22 }
  0x1d   :  { %92 = vmatpush.msra.mxu1 %v49_v23 }
  0x1e   :  { %73 = vmatpush.msra.mxu0 %v32_v24 }
  0x1f   :  { %93 = vmatpush.msra.mxu1 %v48_v25 }
  0x20   :  { %74 = vmatpush.msra.mxu0 %v31_v26 }
  0x21   :  { %94 = vmatpush.msra.mxu1 %v47_v27 }
  0x22   :  { %75 = vmatpush.msra.mxu0 %v30_v28 }
  0x23   :  { %95 = vmatpush.msra.mxu1 %v46_v29 }
  0x24   :  { %76 = vmatpush.msra.mxu0 %v29_v30 }
  0x25   :  { %96 = vmatpush.msra.mxu1 %v45_v31  ;;  %77 = vmatmul.f32.vlgmr.msra.gmra.mxu0 %v27_v32 }
  0x26   :  { %97 = vmatmul.f32.vlgmr.msra.gmra.mxu1 %v28_v33 }
  0xa2   :  { %v78_v34 = vpop.f32.mrf.mxu0 }
  0xa3   :  { %v98_v35 = vpop.f32.mrf.mxu1 }
  0xa4   :  { %v99_v36 = vadd.f32 %v98_v35, %v78_v34 }
  0xa6   :  { %102 = vst.msk [vmem:[%s169_s2] sm:$0xff] %vm101_vm0, %v99_v36 }
  0xa7   :  { %107 = vsyncpa [#allocation3], 1 }

</bundles_post_ra>
